<compile_context>
chip_gen: v7x
topology: tpu7x:2x2x1
jax: 0.10.0
libtpu: 0.0.40
codegen_flags: <defaults>
</compile_context>

<pallas_src>
import functools

import jax
import jax.numpy as jnp
from jax.experimental import pallas as pl
from jax.experimental.pallas import tpu as pltpu


def _res_conv1d_br_kernel(x_ref, w1_ref, b1_ref, w2_ref, b2_ref, o_ref, *,
                          negative_slope):
    # x_ref : (C, tn)  lane-dense tile of one batch element's N axis (io dtype)
    # w1_ref: (H, C), b1_ref: (H, 1)   -- BN-folded net1 (weights in io dtype, bias f32)
    # w2_ref: (C, H), b2_ref: (C, 1)   -- BN-folded net2
    # o_ref : (C, tn)
    x = x_ref[...]                                                     # (C, tn)
    h = jnp.dot(w1_ref[...], x, preferred_element_type=jnp.float32)    # MXU, f32 acc
    h = h + b1_ref[...]
    if negative_slope == 0.0:
        h = jnp.maximum(h, 0.0)                                        # ReLU fast path
    else:
        h = jnp.where(h > 0, h, negative_slope * h)                    # LeakyReLU
    y = jnp.dot(w2_ref[...], h.astype(w2_ref.dtype),                   # MXU, f32 acc
                preferred_element_type=jnp.float32)
    # Re-read x for the residual (cheap vld; avoids keeping the dot input live).
    y = y + b2_ref[...] + x_ref[...].astype(jnp.float32)
    if negative_slope == 0.0:
        y = jnp.maximum(y, 0.0)
    else:
        y = jnp.where(y > 0, y, negative_slope * y)
    o_ref[...] = y.astype(o_ref.dtype)


def _fold_bn(weight, conv_bias, gamma, beta, mean, var, eps):
    """Fold inference BatchNorm1d (and optional conv bias) into W, b (both f32)."""
    scale = gamma.astype(jnp.float32) / jnp.sqrt(var.astype(jnp.float32) + eps)
    w = (weight.astype(jnp.float32) * scale[:, None])          # (C_out, C_in)
    b = beta.astype(jnp.float32) - mean.astype(jnp.float32) * scale
    if conv_bias is not None:
        b = b + conv_bias.astype(jnp.float32) * scale
    return w, b.reshape(-1, 1)                                  # (C_out, 1)


def _pick_tile_n(N, tile_n):
    """Largest 128-multiple divisor of N that is <= tile_n; else full N."""
    if N <= tile_n or N % 128 != 0:
        return N
    t = (tile_n // 128) * 128
    while t >= 128:
        if N % t == 0:
            return t
        t -= 128
    return N


def res_conv1d_br(x, w1, b1, bn1, w2, b2, bn2, *,
                  eps=1e-5, negative_slope=0.0, tile_n=1024):
    """ResConv1dBR forward (eval-mode BN).

    x  : (B, C, N) float32 or bfloat16 (dtype of x is the kernel I/O dtype)
    w1 : (H, C),  b1: (H,) or None, bn1 = (gamma, beta, mean, var) each (H,)
    w2 : (C, H),  b2: (C,) or None, bn2 = (gamma, beta, mean, var) each (C,)
    negative_slope: 0.0 -> ReLU (module default), 0.1 -> LeakyReLU.
    """
    B, C, N = x.shape
    H = w1.shape[0]
    assert w2.shape == (C, H)
    io_dtype = x.dtype

    w1f, b1f = _fold_bn(w1, b1, *bn1, eps)
    w2f, b2f = _fold_bn(w2, b2, *bn2, eps)
    # Dot inputs in the I/O dtype (bf16 when x is bf16); biases stay f32.
    w1f = w1f.astype(io_dtype)
    w2f = w2f.astype(io_dtype)

    tn = _pick_tile_n(N, tile_n)
    grid = (B, N // tn)

    kernel = functools.partial(_res_conv1d_br_kernel,
                               negative_slope=float(negative_slope))

    # NOTE(v7x): for large C/H or tn, budget VMEM explicitly (64 MiB physical) --
    # for C=H=16 the resident weights + double-buffered (C, tn) tiles are tiny.
    out = pl.pallas_call(
        kernel,
        out_shape=jax.ShapeDtypeStruct((B, C, N), io_dtype),
        grid_spec=pltpu.PrefetchScalarGridSpec(
            num_scalar_prefetch=0,
            grid=grid,
            in_specs=[
                pl.BlockSpec((None, C, tn), lambda b, i: (b, 0, i)),  # x tile, native layout
                pl.BlockSpec((H, C), lambda b, i: (0, 0)),            # folded W1 (resident)
                pl.BlockSpec((H, 1), lambda b, i: (0, 0)),            # folded b1 (f32)
                pl.BlockSpec((C, H), lambda b, i: (0, 0)),            # folded W2
                pl.BlockSpec((C, 1), lambda b, i: (0, 0)),            # folded b2 (f32)
            ],
            out_specs=pl.BlockSpec((None, C, tn), lambda b, i: (b, 0, i)),
        ),
        compiler_params=pltpu.CompilerParams(
            dimension_semantics=("parallel", "parallel")),
    )(x, w1f, b1f, w2f, b2f)

    return out


def reference(x, w1, b1, bn1, w2, b2, bn2, *, eps=1e-5, negative_slope=0.0):
    """Pure-JAX reference of ResConv1dBR (eval-mode BN), f32."""
    x = x.astype(jnp.float32)

    def act(t):
        return jnp.where(t > 0, t, negative_slope * t)

    def bn(t, gamma, beta, mean, var):
        return ((t - mean[None, :, None]) / jnp.sqrt(var[None, :, None] + eps)
                * gamma[None, :, None] + beta[None, :, None])

    h = jnp.einsum("oi,bin->bon", w1, x)
    if b1 is not None:
        h = h + b1[None, :, None]
    h = act(bn(h, *bn1))
    y = jnp.einsum("oi,bin->bon", w2, h)
    if b2 is not None:
        y = y + b2[None, :, None]
    y = bn(y, *bn2)
    return act(y + x)


if __name__ == "__main__":
    # ResConv1dBR(in_channels=16, res_expansion=1.0, bias=False, activation='relu')
    B, C, N = 2, 16, 320
    H = int(C * 1.0)                 # hidden = in_channels * res_expansion
    negative_slope = 0.0             # 'relu' (module default)

    key = jax.random.PRNGKey(0)
    ks = jax.random.split(key, 11)

    x = jax.random.normal(ks[0], (B, C, N), dtype=jnp.float32)

    w1 = jax.random.normal(ks[1], (H, C), dtype=jnp.float32) * 0.2
    g1 = 1.0 + 0.1 * jax.random.normal(ks[2], (H,), dtype=jnp.float32)
    be1 = 0.1 * jax.random.normal(ks[3], (H,), dtype=jnp.float32)
    m1 = 0.1 * jax.random.normal(ks[4], (H,), dtype=jnp.float32)
    v1 = jnp.abs(1.0 + 0.1 * jax.random.normal(ks[5], (H,), dtype=jnp.float32))

    w2 = jax.random.normal(ks[6], (C, H), dtype=jnp.float32) * 0.2
    g2 = 1.0 + 0.1 * jax.random.normal(ks[7], (C,), dtype=jnp.float32)
    be2 = 0.1 * jax.random.normal(ks[8], (C,), dtype=jnp.float32)
    m2 = 0.1 * jax.random.normal(ks[9], (C,), dtype=jnp.float32)
    v2 = jnp.abs(1.0 + 0.1 * jax.random.normal(ks[10], (C,), dtype=jnp.float32))

    bn1 = (g1, be1, m1, v1)
    bn2 = (g2, be2, m2, v2)

    ref = reference(x, w1, None, bn1, w2, None, bn2,
                    negative_slope=negative_slope)

    # f32 path (tight tolerance).
    out = res_conv1d_br(x, w1, None, bn1, w2, None, bn2,
                        negative_slope=negative_slope)
    out = jax.block_until_ready(out)
    assert out.shape == (B, C, N)
    assert jnp.allclose(out, ref, atol=1e-4, rtol=1e-4), "f32 mismatch vs reference"

    # bf16 I/O path (memory-bound win; relaxed tolerance vs f32 reference).
    out_bf16 = res_conv1d_br(x.astype(jnp.bfloat16), w1, None, bn1, w2, None, bn2,
                             negative_slope=negative_slope)
    out_bf16 = jax.block_until_ready(out_bf16)
    assert out_bf16.dtype == jnp.bfloat16 and out_bf16.shape == (B, C, N)
    assert jnp.allclose(out_bf16.astype(jnp.float32), ref, atol=1e-1, rtol=1e-1), \
        "bf16 mismatch vs reference"

    print("KERNEL_OK")
</pallas_src>

<mosaic_0001>
module attributes {stable_mosaic.version = 11 : i64} {
  func.func @_res_conv1d_br_kernel(%arg0: i32, %arg1: i32, %arg2: memref<1x16x320xf32, #tpu.memory_space<vmem>>, %arg3: memref<16x16xf32, #tpu.memory_space<vmem>>, %arg4: memref<16x1xf32, #tpu.memory_space<vmem>>, %arg5: memref<16x16xf32, #tpu.memory_space<vmem>>, %arg6: memref<16x1xf32, #tpu.memory_space<vmem>>, %arg7: memref<1x16x320xf32, #tpu.memory_space<vmem>>) attributes {dimension_semantics = [#tpu.dimension_semantics<parallel>, #tpu.dimension_semantics<parallel>], iteration_bounds = array<i64: 2, 1>, scalar_prefetch = 0 : i64, scratch_operands = 0 : i64, tpu.core_type = #tpu.core_type<tc>, window_params = [{transform_indices = @transform_0, window_bounds = array<i64: 1, 16, 320>}, {pipeline_mode = #tpu.pipeline_mode<synchronous>, transform_indices = @transform_1, window_bounds = array<i64: 16, 16>}, {pipeline_mode = #tpu.pipeline_mode<synchronous>, transform_indices = @transform_2, window_bounds = array<i64: 16, 1>}, {pipeline_mode = #tpu.pipeline_mode<synchronous>, transform_indices = @transform_3, window_bounds = array<i64: 16, 16>}, {pipeline_mode = #tpu.pipeline_mode<synchronous>, transform_indices = @transform_4, window_bounds = array<i64: 16, 1>}, {transform_indices = @transform_5, window_bounds = array<i64: 1, 16, 320>}]} {
    %c0 = arith.constant 0 : index
    %c0_0 = arith.constant 0 : index
    %c0_1 = arith.constant 0 : index
    %0 = vector.load %arg2[%c0, %c0_0, %c0_1] : memref<1x16x320xf32, #tpu.memory_space<vmem>>, vector<1x16x320xf32>
    %1 = vector.shape_cast %0 : vector<1x16x320xf32> to vector<16x320xf32>
    %c0_2 = arith.constant 0 : index
    %c0_3 = arith.constant 0 : index
    %2 = vector.load %arg3[%c0_2, %c0_3] : memref<16x16xf32, #tpu.memory_space<vmem>>, vector<16x16xf32>
    %cst = arith.constant dense<0.000000e+00> : vector<16x320xf32>
    %3 = tpu.matmul %2, %1, %cst {dimension_numbers = #tpu.dot_dimension_numbers<[1], [0], [0], [1], [0, 0, 1, 1], [], []>} : vector<16x16xf32>, vector<16x320xf32>, vector<16x320xf32> -> vector<16x320xf32>
    %c0_4 = arith.constant 0 : index
    %c0_5 = arith.constant 0 : index
    %4 = vector.load %arg4[%c0_4, %c0_5] : memref<16x1xf32, #tpu.memory_space<vmem>>, vector<16x1xf32>
    %5 = vector.broadcast %4 : vector<16x1xf32> to vector<16x320xf32>
    %6 = arith.addf %3, %5 : vector<16x320xf32>
    %cst_6 = arith.constant 0.000000e+00 : f32
    %7 = vector.broadcast %cst_6 : f32 to vector<16x320xf32>
    %8 = arith.maximumf %6, %7 : vector<16x320xf32>
    %c0_7 = arith.constant 0 : index
    %c0_8 = arith.constant 0 : index
    %9 = vector.load %arg5[%c0_7, %c0_8] : memref<16x16xf32, #tpu.memory_space<vmem>>, vector<16x16xf32>
    %cst_9 = arith.constant dense<0.000000e+00> : vector<16x320xf32>
    %10 = tpu.matmul %9, %8, %cst_9 {dimension_numbers = #tpu.dot_dimension_numbers<[1], [0], [0], [1], [0, 0, 1, 1], [], []>} : vector<16x16xf32>, vector<16x320xf32>, vector<16x320xf32> -> vector<16x320xf32>
    %c0_10 = arith.constant 0 : index
    %c0_11 = arith.constant 0 : index
    %11 = vector.load %arg6[%c0_10, %c0_11] : memref<16x1xf32, #tpu.memory_space<vmem>>, vector<16x1xf32>
    %12 = vector.broadcast %11 : vector<16x1xf32> to vector<16x320xf32>
    %13 = arith.addf %10, %12 : vector<16x320xf32>
    %c0_12 = arith.constant 0 : index
    %c0_13 = arith.constant 0 : index
    %c0_14 = arith.constant 0 : index
    %14 = vector.load %arg2[%c0_12, %c0_13, %c0_14] : memref<1x16x320xf32, #tpu.memory_space<vmem>>, vector<1x16x320xf32>
    %15 = vector.shape_cast %14 : vector<1x16x320xf32> to vector<16x320xf32>
    %16 = arith.addf %13, %15 : vector<16x320xf32>
    %cst_15 = arith.constant 0.000000e+00 : f32
    %17 = vector.broadcast %cst_15 : f32 to vector<16x320xf32>
    %18 = arith.maximumf %16, %17 : vector<16x320xf32>
    %c0_16 = arith.constant 0 : index
    %c0_17 = arith.constant 0 : index
    %c0_18 = arith.constant 0 : index
    %19 = vector.load %arg7[%c0_16, %c0_17, %c0_18] : memref<1x16x320xf32, #tpu.memory_space<vmem>>, vector<1x16x320xf32>
    %20 = vector.shape_cast %19 : vector<1x16x320xf32> to vector<16x320xf32>
    %21 = vector.shape_cast %18 : vector<16x320xf32> to vector<1x16x320xf32>
    tpu.vector_store %arg7[%c0_16, %c0_17, %c0_18], %21 {strides = array<i32>} : memref<1x16x320xf32, #tpu.memory_space<vmem>>, vector<1x16x320xf32>,
    return
  }
  func.func @transform_0(%arg0: i32, %arg1: i32) -> (i32, i32, i32) {
    %c0_i32 = arith.constant 0 : i32
    %c0_i32_0 = arith.constant 0 : i32
    return %arg0, %c0_i32, %arg1 : i32, i32, i32
  }
  func.func @transform_1(%arg0: i32, %arg1: i32) -> (i32, i32) {
    %c0_i32 = arith.constant 0 : i32
    %c0_i32_0 = arith.constant 0 : i32
    %c0_i32_1 = arith.constant 0 : i32
    return %c0_i32, %c0_i32_0 : i32, i32
  }
  func.func @transform_2(%arg0: i32, %arg1: i32) -> (i32, i32) {
    %c0_i32 = arith.constant 0 : i32
    %c0_i32_0 = arith.constant 0 : i32
    %c0_i32_1 = arith.constant 0 : i32
    return %c0_i32, %c0_i32_0 : i32, i32
  }
  func.func @transform_3(%arg0: i32, %arg1: i32) -> (i32, i32) {
    %c0_i32 = arith.constant 0 : i32
    %c0_i32_0 = arith.constant 0 : i32
    %c0_i32_1 = arith.constant 0 : i32
    return %c0_i32, %c0_i32_0 : i32, i32
  }
  func.func @transform_4(%arg0: i32, %arg1: i32) -> (i32, i32) {
    %c0_i32 = arith.constant 0 : i32
    %c0_i32_0 = arith.constant 0 : i32
    %c0_i32_1 = arith.constant 0 : i32
    return %c0_i32, %c0_i32_0 : i32, i32
  }
  func.func @transform_5(%arg0: i32, %arg1: i32) -> (i32, i32, i32) {
    %c0_i32 = arith.constant 0 : i32
    %c0_i32_0 = arith.constant 0 : i32
    return %arg0, %c0_i32, %arg1 : i32, i32, i32
  }
}

</mosaic_0001>

<bundles_post_ra>
// kernel: tpu_custom_call.1
= control target key start
LH: loop header
LB: loop body
LE: loop exit
PB: predicated region body
PF: predicated region fallthrough
CT: control target
= control target key end

     0   :  { %10 = vsyncpa [#allocation3], 0  ;;  %s1262_s0 = inlined_call_operand.hbm [shape: f32[2,16,320], index: 0, kind: input, shape index: {}]   ;;  %s1263_s1 = inlined_call_operand.vmem [shape: f32[16,16], index: 1, kind: input, shape index: {}]   ;;  %s1264_s2 = inlined_call_operand.vmem [shape: f32[16,1], index: 2, kind: input, shape index: {}]   ;;  %s1265_s3 = inlined_call_operand.vmem [shape: f32[16,16], index: 3, kind: input, shape index: {}]   ;;  %s1266_s4 = inlined_call_operand.vmem [shape: f32[16,1], index: 4, kind: input, shape index: {}]   ;;  %s1267_s5 = inlined_call_operand.hbm [shape: f32[2,16,320], index: 5, kind: output, shape index: {}]  }
   0x1   :  { %12 = vsyncpa [#allocation3 + $0x1], 0 }
   0x2   :  { %13 = vsyncpa [#allocation4], 0 }
   0x3   :  { %15 = vsyncpa [#allocation4 + $0x1], 0  ;;  %s1023_s18 = smov 0   ;;  %s1025_s19 = smov 0  }
   0x4   :  { %s1027_s20 = smov 0   ;;  %s1029_s21 = smov 0  }
   0x5   :  { %s1031_s22 = smov 0   ;;  %s1033_s23 = smov 0  }
   0x6 LB: > { %s742_s24 = sadd.s32 4294967295, %s983_s23   ;;  %s743_s25 = sadd.s32 4294967294, %s983_s23   ;;  %s983_s23 = sphi %s1033_s23, %s21_s23   ;;  %s979_s22 = sphi %s1031_s22, %s1282_s22   ;;  %s975_s21 = sphi %s1029_s21, %s1281_s21   ;;  %s971_s20 = sphi %s1027_s20, %s1280_s20   ;;  %s967_s19 = sphi %s1025_s19, %s1279_s19   ;;  %s963_s18 = sphi %s1023_s18, %s1278_s18  }
   0x7   : > { %s33_s26 = sadd.s32 1, %s979_s22  ;;  %s42_s27 = sadd.s32 1, %s971_s20 }
   0x8   : > { %p35_p0 = scmp.ge.s32.totalorder %s33_s26, 2  ;;  %p49_p1 = scmp.ne.s32.totalorder %s971_s20, %s967_s19 }
   0x9   : > { %p50_p2 = scmp.eq.s32.totalorder %s983_s23, 0  ;;  %p55_p3 = scmp.ne.s32.totalorder %s967_s19, %s963_s18 }
   0xa   : > { %s1284_s26 = smov (%p35_p0, %s33_s26), 0  ;;  %p56_p5 = scmp.eq.s32.totalorder %s742_s24, 0 }
   0xb   : > { %p1064_p4 = por %p50_p2, %p49_p1  ;;  %s37_s29 = ssub.s32 %s979_s22, %s1284_s26 }
   0xc   : > { %p165_p6 = scmp.eq.s32.totalorder %s742_s24, 1  ;;  %p40_p7 = scmp.eq.s32.totalorder %s37_s29, 0 }
   0xd   : > { %p1070_p8 = por %p56_p5, %p55_p3  ;;  %p171_p10 = scmp.eq.s32.totalorder %s743_s25, 1 }
   0xe   : > { %p1074_p9 = por %p165_p6, %p49_p1  ;;  %p813_p13 = scmp.lt.s32.totalorder %s983_s23, 2 }
   0xf   : > { %s1079_s7 = scalar_select %p40_p7, %s971_s20, %s42_s27  }
  0x10   : > { %s1271_s6 = scalar_select %p1074_p9, 1, 0 }
  0x11   : > { %p1081_p11 = por %p171_p10, %p55_p3  ;;  %s203_s9 = sand.u32 1, %s971_s20  }
  0x12   : > { %s797_s10 = smul.u32 48, %s203_s9  ;;  %p1091_p0 = pnand %p813_p13, %p1064_p4 }
  0x13   : > { %s1272_s8 = scalar_select %p1081_p11, 1, 0 }
  0x14   : > { %s798_s11 = smul.u32 768, %s979_s22  ;;  %s207_s16 = scalar_lea.vmem [#allocation2], %s797_s10 }
  0x15   : > { %s216_s17 = sshll.u32 %s207_s16, 4  ;;  %s1103_s24 = scalar_lea.sflag [#allocation3], %s203_s9  ;;  %s1100_s17 = int_to_ptr.vmem [resolvable:$true] %s216_s17 }
  0x16   : > { %s1098_s15 = scalar_lea.hbm %s1262_s0, %s798_s11  ;;  %p873_p3 = pneg %p1091_p0 }
  0x17   : > { %s871_s25 = scalar_lea.hbm %s1098_s15, 768  ;;  %s876_s29 = scalar_lea.hbm %s1262_s0, 1536 }
  0x18   : > { %p872_p2 = scmp.ne.s32.totalorder %s1098_s15, %s871_s25  ;;  %p877_p6 = scmp.lt.u32.totalorder %s1098_s15, %s1262_s0 }
  0x19   : > { %p878_p7 = scmp.lt.u32.totalorder %s876_s29, %s871_s25  ;;  %p880_p13 = scmp.lt.u32.totalorder %s871_s25, %s1098_s15 }
  0x1a   : > { %p874_p4 = pnand %p873_p3, %p872_p2 }
  0x1b   : > { %p879_p10 = por %p878_p7, %p877_p6 }
  0x1c   : > { %p875_p5 = pneg %p874_p4 }
  0x1d   : > { %p881_p12 = por %p880_p13, %p879_p10 }
  0x1f   : > { %p882_p1 = pnand %p881_p12, %p875_p5 }
  0x21   : > { %885 = shalt.err (!%p882_p1)
}
  0x22   : > { %s886_s9 = scalar_lea.vmem %s1100_s17, 768  ;;  %s985_s13 = smov [#allocation2]  }
  0x23   : > { %p887_p2 = scmp.ne.s32.totalorder %s1100_s17, %s886_s9  ;;  %s891_s14 = sshll.u32 %s985_s13, 4  ;;  %s892_s14 = int_to_ptr.vmem [resolvable:$false] %s891_s14 }
  0x24   : > { %s893_s16 = scalar_lea.vmem %s892_s14, 1536  ;;  %p894_p9 = scmp.lt.s32.totalorder %s1100_s17, %s892_s14 }
  0x25   : > { %p889_p4 = pnand %p887_p2, %p873_p3  ;;  %p895_p6 = scmp.lt.s32.totalorder %s893_s16, %s886_s9 }
  0x27   : > { %p890_p11 = pneg %p889_p4  ;;  %p896_p7 = por %p895_p6, %p894_p9 }
  0x29   : > { %p897_p10 = pnand %p896_p7, %p890_p11 }
  0x2b   : > { %900 = shalt.err (!%p897_p10)
}
  0x2c   : > { %s986_s25 = smov 384   ;;  %s987_s27 = smov 24  }
  0x2d   : > { %808 = dma.hbm_to_vmem [thread:$0]  (!%p1091_p0), %s1098_s15, 768, %s1100_s17, %s1103_s24, %s986_s25, %s986_s25, %s987_s27  }
  0x2e   : > { %p224_p12 = scmp.lt.s32.totalorder %s983_s23, 3  ;;  %p1274_p1 = scmp.ge.s32.totalorder %s983_s23, 1 }
  0x30   : > { %p225_p3 = pnand %p1274_p1, %p224_p12 }
  0x31   : > { %s1135_s28 = sand.u32 (!%p225_p3), 1, %s967_s19  }
  0x32   : > { %228 = sbr.rel (%p225_p3) target bundleno = 531 (0x213), region = 40  ;;  %s231_s11 = scalar_lea.sflag (!%p225_p3), [#allocation3], %s1135_s28 }
  0x33   : > { %s799_s29 = smul.u32 (!%p225_p3), 48, %s1135_s28 }
  0x35   : > { %s234_s10 = scalar_lea.vmem (!%p225_p3), [#allocation2], %s799_s29 }
  0x39   : > { %954 = dma.done.wait (%p1070_p8), %s231_s11, 768  }
  0x3a   : > { %956 = vsyncadd (%p1070_p8), %s231_s11, 4294966528  ;;  %v988_v0 = vmov 0.0   ;;  %v989_v1 = vmov 0   ;;  %v1146_v2 = vld [vmem:[%s234_s10 + $0x8] sm:$0xff]  ;;  %v1148_v3 = vld [vmem:[%s234_s10 + $0x20] sm:$0xff]  ;;  %vm283_vm0 = vcmask 130048  }
  0x3b   : > { %354 = vmatprep.mubr.f32.mxu0 %v988_v0  ;;  %869 = vset.pattern.permute.xlu0 %v989_v1  ;;  %v1150_v4 = vld [vmem:[%s234_s10 + $0x10] sm:$0xff]  ;;  %v781_v5 = vpack.c.bf16 %v1148_v3, %v1146_v2  ;;  %v1154_v6 = vld [vmem:[%s234_s10 + $0x28] sm:$0xff]  ;;  %v1156_v7 = vld [vmem:[%s234_s10] sm:$0xff]  ;;  %vm634_vm1 = vcmask 523264   ;;  %s260_s17 = scalar_lea.vmem [#allocation5], %s799_s29  ;;  %s800_s9 = smul.u32 768, %s975_s21 }
  0x3c   : > { %870 = vset.pattern.permute.xlu1 %v989_v1  ;;  %v1158_v8 = vld [vmem:[%s234_s10 + $0x18] sm:$0xff]  ;;  %v785_v9 = vpack.c.bf16 %v1154_v6, %v1150_v4  ;;  %v269_v11 = vld [vmem:[%s1263_s1] sm:$0xff]  ;;  %s655_s24 = sshll.u32 %s260_s17, 4  ;;  %s640_s21 = scalar_lea.sflag [#allocation4], %s1135_s28  ;;  %s1207_s24 = int_to_ptr.vmem [resolvable:$true] %s655_s24 }
  0x3d   : > { %v783_v10 = vpack.c.bf16 %v1158_v8, %v1156_v7  ;;  %v271_v12 = vld [vmem:[%s1264_s2] sm:$0xff]  ;;  %782 = vmatprep.subr.bf16.mxu0 %v781_v5  ;;  %771 = vmatprep.mubr.msk.f32.mxu1 %vm283_vm0, %v269_v11  ;;  %v270_v13 = vld [vmem:[%s1263_s1 + $0x8] sm:$0xff]  ;;  %s1213_s14 = scalar_lea.hbm %s1267_s5, %s800_s9  ;;  %s901_s16 = scalar_lea.vmem %s1207_s24, 768 }
  0x3e   : > { %786 = vmatprep.subr.bf16.mxu1 %v785_v9  ;;  %275 = vperm.xlu0 %869, %v271_v12   ;;  %v272_v14 = vld [vmem:[%s1264_s2 + $0x8] sm:$0xff]  ;;  %v448_v15 = vld [vmem:[%s1265_s3] sm:$0xff]  ;;  %p902_p8 = scmp.ne.s32.totalorder %s1207_s24, %s901_s16  ;;  %p1275_p9 = scmp.ne.s32.totalorder %s1271_s6, 0 }
  0x3f   : > { %784 = vmatpush1.bf16.msra.mxu0 %v783_v10  ;;  %788 = vmatpush3.bf16.msra.mxu1 %v785_v9  ;;  %v450_v16 = vld [vmem:[%s1266_s4] sm:$0xff]  ;;  %v451_v17 = vld [vmem:[%s1266_s4 + $0x8] sm:$0xff]  ;;  %s990_s25 = smov [#allocation5]  }
  0x40   : > { %454 = vperm.xlu1 %870, %v450_v16   ;;  %v449_v41 = vld [vmem:[%s1265_s3 + $0x8] sm:$0xff]  ;;  %p903_p11 = pnand %p902_p8, %p1275_p9  ;;  %s905_s27 = sshll.u32 %s990_s25, 4  ;;  %s906_s27 = int_to_ptr.vmem [resolvable:$false] %s905_s27 }
  0x41   : > { %s907_s11 = scalar_lea.vmem %s906_s27, 1536  ;;  %p908_p5 = scmp.lt.s32.totalorder %s1207_s24, %s906_s27 }
  0x42   : > { %748 = vmatmul.mubr.msk.f32.vlgmr.msra.gmra.mrb[0].mxu0 %vm283_vm0, %v269_v11  ;;  %772 = vmatmul.mubr.msk.f32.vlgmr.msra.gmra.mrb[0].mxu1 %vm283_vm0, %v270_v13  ;;  %p904_p0 = pneg %p903_p11  ;;  %p909_p13 = scmp.lt.s32.totalorder %s907_s11, %s901_s16 }
  0x43   : > { %360 = vmatprep.mubr.f32.mxu0 %v988_v0  ;;  %280 = vperm.xlu0 %869, %v272_v14  }
  0x44   : > { %532 = vmatprep.mubr.f32.mxu1 %v988_v0  ;;  %459 = vperm.xlu1 %870, %v451_v17   ;;  %p910_p2 = por %p909_p13, %p908_p5 }
  0x46   : > { %749 = vmatmul.mubr.msk.f32.gmra.mrb[2].mxu0 %vm283_vm0, %v270_v13  ;;  %p911_p4 = pnand %p910_p2, %p904_p0 }
  0x47   : > { %778 = vmatprep.mubr.msk.f32.mxu0 %vm283_vm0, %v448_v15 }
  0xbd   : > { %v276_v18 = vpop.permute.xlu0 %275 }
  0xbf   : > { %v455_v42 = vpop.permute.xlu1 %454 }
  0xc2   : > { %v281_v19 = vpop.permute.xlu0 %280 }
  0xc3   : > { %v460_v43 = vpop.permute.xlu1 %459 }
 0x115   : > { %v356_v20 = vpop.f32.mrb[0].mxu0  ;;  %v773_v21 = vpop.f32.mrb[0].mxu1 }
 0x116   : > { %v358_v22 = vpop.f32.mrb[1].mxu0  ;;  %v439_v23 = vadd.f32 %v773_v21, %v281_v19  ;;  %v433_v24 = vpop.f32.mrb[1].mxu1  ;;  %v357_v25 = vadd.f32 %v356_v20, %v276_v18 }
 0x117   : > { %v434_v26 = vadd.f32 %v433_v24, %v276_v18  ;;  %v359_v28 = vadd.f32 %v358_v22, %v276_v18 }
 0x118   : > { %v447_v27 = vmax.f32 %v439_v23, 0.0  ;;  %v442_v34 = vmax.f32 %v357_v25, 0.0 }
 0x119   : > { %v362_v29 = vpop.f32.mrb[2].mxu0  ;;  %v444_v30 = vmax.f32 %v434_v26, 0.0  ;;  %v443_v37 = vmax.f32 %v359_v28, 0.0 }
 0x11a   : > { %v363_v31 = vadd.f32 %v362_v29, %v281_v19  ;;  %v364_v32 = vpop.f32.mrb[3].mxu0 }
 0x11b   : > { %v365_v33 = vadd.f32 %v364_v32, %v281_v19  ;;  %v793_v35 = vpack.c.bf16 %v447_v27, %v444_v30 }
 0x11c   : > { %v445_v36 = vmax.f32 %v363_v31, 0.0 }
 0x11d   : > { %v446_v38 = vmax.f32 %v365_v33, 0.0  ;;  %794 = vmatprep.subr.bf16.mxu0 %v793_v35 }
 0x11e   : > { %v791_v39 = vpack.c.bf16 %v445_v36, %v442_v34  ;;  %796 = vmatpush3.bf16.msra.mxu0 %v793_v35 }
 0x11f   : > { %v789_v40 = vpack.c.bf16 %v446_v38, %v443_v37 }
 0x121   : > { %790 = vmatprep.subr.bf16.mxu1 %v789_v40  ;;  %779 = vmatmul.mubr.msk.f32.vlgmr.msra.gmra.mrb[4].mxu0 %vm283_vm0, %v449_v41 }
 0x122   : > { %792 = vmatpush1.bf16.msra.mxu1 %v791_v39 }
 0x125   : > { %752 = vmatmul.mubr.msk.f32.vlgmr.msra.gmra.mrb[2].mxu1 %vm283_vm0, %v448_v15 }
 0x126   : > { %538 = vmatprep.mubr.f32.mxu1 %v988_v0 }
 0x129   : > { %753 = vmatmul.mubr.msk.f32.gmra.mrb[4].mxu1 %vm283_vm0, %v449_v41 }
 0x1f4   : > { %v780_v44 = vpop.f32.mrb[4].mxu0 }
 0x1f5   : > { %v617_v45 = vadd.f32 %v780_v44, %v460_v43  ;;  %v611_v46 = vpop.f32.mrb[5].mxu0 }
 0x1f6   : > { %v612_v47 = vadd.f32 %v611_v46, %v455_v42 }
 0x1f7   : > { %v625_v49 = vadd.f32 %v617_v45, %v1154_v6 }
 0x1f8   : > { %v534_v48 = vpop.f32.mrb[2].mxu1  ;;  %v622_v52 = vadd.f32 %v612_v47, %v1150_v4 }
 0x1f9   : > { %v535_v50 = vadd.f32 %v534_v48, %v455_v42  ;;  %v536_v51 = vpop.f32.mrb[3].mxu1  ;;  %v631_v54 = vmax.f32 %v625_v49, 0.0 }
 0x1fa   : > { %v537_v53 = vadd.f32 %v536_v51, %v455_v42  ;;  %v628_v56 = vmax.f32 %v622_v52, 0.0 }
 0x1fb   : > { %v620_v55 = vadd.f32 %v535_v50, %v1156_v7  ;;  %638 = vst.msk [vmem:[%s260_s17 + $0x28] sm:$0xff] %vm634_vm1, %v631_v54 }
 0x1fc   : > { %v621_v57 = vadd.f32 %v537_v53, %v1146_v2  ;;  %v540_v58 = vpop.f32.mrb[4].mxu1  ;;  %635 = vst.msk [vmem:[%s260_s17 + $0x10] sm:$0xff] %vm634_vm1, %v628_v56 }
 0x1fd   : > { %v626_v59 = vmax.f32 %v620_v55, 0.0  ;;  %v541_v60 = vadd.f32 %v540_v58, %v460_v43  ;;  %v542_v61 = vpop.f32.mrb[5].mxu1 }
 0x1fe   : > { %v627_v62 = vmax.f32 %v621_v57, 0.0  ;;  %v543_v63 = vadd.f32 %v542_v61, %v460_v43 }
 0x1ff   : > { %632 = vst [vmem:[%s260_s17] sm:$0xff] %v626_v59  ;;  %v623_v0 = vadd.f32 %v541_v60, %v1158_v8 }
 0x200   : > { %633 = vst [vmem:[%s260_s17 + $0x8] sm:$0xff] %v627_v62  ;;  %v624_v1 = vadd.f32 %v543_v63, %v1148_v3 }
 0x201   : > { %v629_v2 = vmax.f32 %v623_v0, 0.0 }
 0x202   : > { %v630_v4 = vmax.f32 %v624_v1, 0.0 }
 0x203   : > { %636 = vst [vmem:[%s260_s17 + $0x18] sm:$0xff] %v629_v2 }
 0x204   : > { %637 = vst [vmem:[%s260_s17 + $0x20] sm:$0xff] %v630_v4 }
 0x205   : > { %914 = shalt.err (!%p911_p4)
}
 0x206   : > { %s915_s10 = scalar_lea.hbm %s1213_s14, 768  ;;  %s919_s15 = scalar_lea.hbm %s1267_s5, 1536 }
 0x207   : > { %p916_p6 = scmp.ne.s32.totalorder %s1213_s14, %s915_s10  ;;  %p920_p12 = scmp.lt.u32.totalorder %s1213_s14, %s1267_s5 }
 0x208   : > { %p921_p1 = scmp.lt.u32.totalorder %s919_s15, %s915_s10  ;;  %p923_p8 = scmp.lt.u32.totalorder %s915_s10, %s1213_s14 }
 0x209   : > { %p917_p7 = pnand %p916_p6, %p1275_p9 }
 0x20a   : > { %p922_p3 = por %p921_p1, %p920_p12 }
 0x20b   : > { %p918_p10 = pneg %p917_p7 }
 0x20c   : > { %p924_p11 = por %p923_p8, %p922_p3 }
 0x20e   : > { %p925_p0 = pnand %p924_p11, %p918_p10 }
 0x210   : > { %928 = shalt.err (!%p925_p0)
}
 0x211   : > { %s991_s29 = smov 384   ;;  %s992_s13 = smov 24  }
 0x212   : > { %803 = dma.vmem_to_hbm [thread:$0]  (%p1275_p9), %s1207_s24, 768, %s1213_s14, %s640_s21, %s991_s29, %s991_s29, %s992_s13  }
 0x213 PF: > { %s670_s16 = sand.u32 1, %s963_s18   ;;  %p1276_p5 = scmp.ne.s32.totalorder %s1272_s8, 0 }
 0x214   : > { %p1277_p13 = scmp.ge.s32.totalorder %s983_s23, 2  ;;  %s671_s25 = scalar_lea.sflag [#allocation4], %s670_s16 }
 0x216   : > { %p810_p2 = pnand %p1277_p13, %p1276_p5 }
 0x218   : > { %958 = dma.done.wait (!%p810_p2), %s671_s25, 768  }
 0x219   : > { %960 = vsyncadd (!%p810_p2), %s671_s25, 4294966528  ;;  %s21_s23 = sadd.s32 1, %s983_s23   ;;  %s1278_s18 = smov %s967_s19 }
 0x21a   : > { %p18_p4 = scmp.ge.s32.totalorder %s21_s23, 4   ;;  %s1279_s19 = smov %s971_s20 }
 0x21b   : > { %s1280_s20 = smov %s1079_s7  ;;  %s1281_s21 = smov %s979_s22 }
 0x21c   : > { %s1282_s22 = smov %s1284_s26  ;;  %20 = sbr.rel (!%p18_p4) target bundleno = 6 (0x6), region = 85 }
 0x223   :  { %676 = vsyncpa [#allocation3], 1 }
 0x224   :  { %678 = vsyncpa [#allocation3 + $0x1], 1 }
 0x225   :  { %679 = vsyncpa [#allocation4], 1 }
 0x226   :  { %681 = vsyncpa [#allocation4 + $0x1], 1 }

</bundles_post_ra>
